<compile_context>
chip_gen: v7x
topology: tpu7x:2x2x1
jax: 0.10.0
libtpu: 0.0.40
codegen_flags: <defaults>
</compile_context>

<pallas_src>
import jax
import jax.numpy as jnp
from jax.experimental import pallas as pl
from jax.experimental.pallas import tpu as pltpu

# ---- model hyper-parameters (from the PyTorch module __init__) ----------------
INPUT_SIZE = 1
HIDDEN_SIZE = 15
OUT_SIZE = 1
SYNTH_SIZE = 3
GLR = 0.01

# Padded hidden size for the packed parameter slab (rows multiple of 8).
HP = 16
N_COLS = 4  # w1 | b1 | w2 | b2

# The lane-major relabels below (x.reshape(1,B), w2 (1,H)->(H,1)) are only
# valid because these are 1.
assert INPUT_SIZE == 1, "kernel layout assumes INPUT_SIZE == 1"
assert OUT_SIZE == 1, "kernel layout assumes OUT_SIZE == 1"


# ---- packing helper ------------------------------------------------------------
def _pack_params(w1, b1, w2, b2):
    """Pack PyTorch-convention params into one (HP, 4) f32 slab.

    Columns: 0 -> w1 (H,IN=1), 1 -> b1 (H,), 2 -> w2 (OUT=1,H), 3 -> b2 (OUT,).
    Rows 15.. are zero padding; the zero pad in the w2 column guarantees the
    padded hidden row contributes nothing to the layer-2 reduction.
    """
    pad_h = HP - HIDDEN_SIZE
    c0 = jnp.pad(w1.reshape(HIDDEN_SIZE).astype(jnp.float32), (0, pad_h))
    c1 = jnp.pad(b1.reshape(HIDDEN_SIZE).astype(jnp.float32), (0, pad_h))
    c2 = jnp.pad(w2.reshape(HIDDEN_SIZE).astype(jnp.float32), (0, pad_h))
    c3 = jnp.pad(b2.reshape(OUT_SIZE).astype(jnp.float32), (0, HP - OUT_SIZE))
    return jnp.stack([c0, c1, c2, c3], axis=1)  # (HP, 4)


# ---- Pallas kernels: two Linear layers + Tanh, lane-major, VPU/XLU only --------
def _mlp_core(x, p, o_ref):
    # x: (1, B)   p: (HP, 4) packed [w1 | b1 | w2 | b2]   o_ref: (1, B)
    w1 = p[:, 0:1]          # (HP, 1)
    b1 = p[:, 1:2]          # (HP, 1)
    w2 = p[:, 2:3]          # (HP, 1), zero in padded rows
    b2 = p[0:1, 3:4]        # (1, 1)
    # Layer 1 (K=1): outer product as a VPU broadcast multiply + EUP tanh.
    h = jnp.tanh(w1 * x + b1)                              # (HP, B)
    # Layer 2 (K=H, N=1): elementwise multiply + sublane reduce on the XLU.
    s = jnp.sum(w2 * h, axis=0, keepdims=True) + b2        # (1, B)
    o_ref[...] = jnp.tanh(s).astype(o_ref.dtype)


def _mlp_kernel(x_ref, p_ref, o_ref):
    _mlp_core(x_ref[...], p_ref[...], o_ref)


def _mlp_gc_kernel(x_ref, p_ref, g_ref, o_ref):
    # Gradient correction: ONE VALU op on the packed slab, on the idle VPU.
    _mlp_core(x_ref[...], p_ref[...] - GLR * g_ref[...], o_ref)


def _call_kernel(kernel, batch, *args):
    # No grid: whole arrays are single VMEM-resident blocks (a few KB total).
    # TODO(synk): for large batch, add a grid over the lane axis marked
    # "parallel" (2 TCs on v7x) and size the lane tile per-chip VMEM.
    return pl.pallas_call(
        kernel,
        out_shape=jax.ShapeDtypeStruct((1, batch), jnp.float32),
        in_specs=[pl.BlockSpec(memory_space=pltpu.MemorySpace.VMEM)] * len(args),
        out_specs=pl.BlockSpec(memory_space=pltpu.MemorySpace.VMEM),
    )(*args)


@jax.jit
def _forward_plain(x, params):
    batch = x.shape[0]
    # (B, 1) -> (1, B): pure relabel since INPUT_SIZE == 1 (batch on lanes).
    x_lm = x.reshape(1, batch).astype(jnp.float32)
    out = _call_kernel(_mlp_kernel, batch, x_lm, params)
    return out.reshape(batch, OUT_SIZE)


@jax.jit
def _forward_gc(x, params, g0, g1, g2, g3):
    batch = x.shape[0]
    x_lm = x.reshape(1, batch).astype(jnp.float32)
    # Pack the per-call gradients into one slab (tiny, XLA-fused concat);
    # zero padding keeps the slab subtraction semantics exact.
    grads = _pack_params(g0, g1, g2, g3)
    out = _call_kernel(_mlp_gc_kernel, batch, x_lm, params, grads)
    return out.reshape(batch, OUT_SIZE)


# ---- Python-side module mirroring SynthNNet.forward ---------------------------
class SynthNNetPallas:
    def __init__(self, key):
        k1, k2, k3, k4, k5 = jax.random.split(key, 5)
        # PyTorch nn.Linear init: U(-1/sqrt(fan_in), 1/sqrt(fan_in)); deterministic here.
        bound1 = 1.0 / (INPUT_SIZE ** 0.5)
        bound2 = 1.0 / (HIDDEN_SIZE ** 0.5)
        # Stored in PyTorch convention: weight (out, in), bias (out,)
        self.w1 = jax.random.uniform(k1, (HIDDEN_SIZE, INPUT_SIZE), jnp.float32,
                                     -bound1, bound1)
        self.b1 = jax.random.uniform(k2, (HIDDEN_SIZE,), jnp.float32, -bound1, bound1)
        self.w2 = jax.random.uniform(k3, (OUT_SIZE, HIDDEN_SIZE), jnp.float32,
                                     -bound2, bound2)
        self.b2 = jax.random.uniform(k4, (OUT_SIZE,), jnp.float32, -bound2, bound2)
        # Packed parameter slab, built once (no per-call concat on the plain path).
        self.params = _pack_params(self.w1, self.b1, self.w2, self.b2)
        # z_x parameter (synthetic points), z_y = sin_gini(z_x) -- not used in forward.
        self.z_x = 2.5 * jax.random.normal(k5, (SYNTH_SIZE, 1), jnp.float32)
        self.z_y = jnp.sin(self.z_x * 2.0)  # sin_gini with w=2, t=0, s=1
        self.glr = GLR
        self.training = True

    def forward(self, x, ggradients=None):
        x = jnp.asarray(x, jnp.float32)
        if self.training and ggradients is not None:
            return _forward_gc(x, self.params,
                               ggradients[0], ggradients[1],
                               ggradients[2], ggradients[3])
        return _forward_plain(x, self.params)

    # TODO(synk): model_train / model_test / update_nnet involve autograd + Adam/SGD
    # optimizer loops; only the forward pass is implemented as a Pallas kernel here.


def _reference_forward(model, x, ggradients=None):
    w1, b1, w2, b2 = model.w1, model.b1, model.w2, model.b2
    if ggradients is not None:
        w1 = w1 - model.glr * ggradients[0]
        b1 = b1 - model.glr * ggradients[1]
        w2 = w2 - model.glr * ggradients[2]
        b2 = b2 - model.glr * ggradients[3]
    h = jnp.tanh(x @ w1.T + b1)
    return jnp.tanh(h @ w2.T + b2)


if __name__ == "__main__":
    key = jax.random.PRNGKey(0)
    k_model, k_x, kg0, kg1, kg2, kg3 = jax.random.split(key, 6)

    model = SynthNNetPallas(k_model)

    batch = 8
    x = jax.random.normal(k_x, (batch, INPUT_SIZE), jnp.float32)

    # Plain forward (eval / no-ggradients path).
    out = jax.block_until_ready(model.forward(x))
    ref = _reference_forward(model, x)
    assert out.shape == (batch, OUT_SIZE)
    assert jnp.allclose(out, ref, atol=1e-5, rtol=1e-5)

    # Gradient-corrected forward path.
    ggrads = (
        0.1 * jax.random.normal(kg0, (HIDDEN_SIZE, INPUT_SIZE), jnp.float32),
        0.1 * jax.random.normal(kg1, (HIDDEN_SIZE,), jnp.float32),
        0.1 * jax.random.normal(kg2, (OUT_SIZE, HIDDEN_SIZE), jnp.float32),
        0.1 * jax.random.normal(kg3, (OUT_SIZE,), jnp.float32),
    )
    out_g = jax.block_until_ready(model.forward(x, ggradients=ggrads))
    ref_g = _reference_forward(model, x, ggradients=ggrads)
    assert jnp.allclose(out_g, ref_g, atol=1e-5, rtol=1e-5)

    print("KERNEL_OK")
</pallas_src>

<mosaic_0001>
module attributes {stable_mosaic.version = 11 : i64} {
  func.func @_mlp_kernel(%arg0: memref<1x8xf32, #tpu.memory_space<vmem>>, %arg1: memref<16x4xf32, #tpu.memory_space<vmem>>, %arg2: memref<1x8xf32, #tpu.memory_space<vmem>>) attributes {dimension_semantics = [], scalar_prefetch = 0 : i64, scratch_operands = 0 : i64, tpu.core_type = #tpu.core_type<tc>} {
    %c0 = arith.constant 0 : index
    %c0_0 = arith.constant 0 : index
    %0 = vector.load %arg0[%c0, %c0_0] : memref<1x8xf32, #tpu.memory_space<vmem>>, vector<1x8xf32>
    %c0_1 = arith.constant 0 : index
    %c0_2 = arith.constant 0 : index
    %1 = vector.load %arg1[%c0_1, %c0_2] : memref<16x4xf32, #tpu.memory_space<vmem>>, vector<16x4xf32>
    %2 = vector.extract_strided_slice %1 {offsets = [0, 0], sizes = [16, 1], strides = [1, 1]} : vector<16x4xf32> to vector<16x1xf32>
    %3 = vector.extract_strided_slice %1 {offsets = [0, 1], sizes = [16, 1], strides = [1, 1]} : vector<16x4xf32> to vector<16x1xf32>
    %4 = vector.extract_strided_slice %1 {offsets = [0, 2], sizes = [16, 1], strides = [1, 1]} : vector<16x4xf32> to vector<16x1xf32>
    %5 = vector.extract_strided_slice %1 {offsets = [0, 3], sizes = [1, 1], strides = [1, 1]} : vector<16x4xf32> to vector<1x1xf32>
    %6 = vector.broadcast %2 : vector<16x1xf32> to vector<16x8xf32>
    %7 = vector.broadcast %0 : vector<1x8xf32> to vector<16x8xf32>
    %8 = arith.mulf %6, %7 : vector<16x8xf32>
    %9 = vector.broadcast %3 : vector<16x1xf32> to vector<16x8xf32>
    %10 = arith.addf %8, %9 : vector<16x8xf32>
    %11 = math.tanh %10 : vector<16x8xf32>
    %12 = vector.broadcast %4 : vector<16x1xf32> to vector<16x8xf32>
    %13 = arith.mulf %12, %11 : vector<16x8xf32>
    %cst = arith.constant dense<0.000000e+00> : vector<8xf32>
    %14 = vector.multi_reduction <add>, %13, %cst [0] : vector<16x8xf32> to vector<8xf32>
    %15 = vector.shape_cast %14 : vector<8xf32> to vector<1x8xf32>
    %16 = vector.broadcast %5 : vector<1x1xf32> to vector<1x8xf32>
    %17 = arith.addf %15, %16 : vector<1x8xf32>
    %18 = math.tanh %17 : vector<1x8xf32>
    %c0_3 = arith.constant 0 : index
    %c0_4 = arith.constant 0 : index
    %19 = vector.load %arg2[%c0_3, %c0_4] : memref<1x8xf32, #tpu.memory_space<vmem>>, vector<1x8xf32>
    tpu.vector_store %arg2[%c0_3, %c0_4], %18 {strides = array<i32>} : memref<1x8xf32, #tpu.memory_space<vmem>>, vector<1x8xf32>,
    return
  }
}

</mosaic_0001>

<bundles_post_ra>
// kernel: _forward_plain.1
= control target key start
LH: loop header
LB: loop body
LE: loop exit
PB: predicated region body
PF: predicated region fallthrough
CT: control target
= control target key end

     0   :  { %v129_v1 = vmov 1   ;;  %v130_v2 = vmov 0   ;;  %s170_s0 = inlined_call_operand.vmem [shape: f32[1,8], index: 0, kind: input, shape index: {}]   ;;  %s171_s1 = inlined_call_operand.vmem [shape: f32[16,4], index: 1, kind: input, shape index: {}]   ;;  %s172_s2 = inlined_call_operand.hbm [shape: f32[1,8], index: 2, kind: output, shape index: {}]  }
   0x1   :  { %v13_v0 = vld [vmem:[%s171_s1] sm:$0xff]  ;;  %94 = vset.pattern.permute.xlu1 %v129_v1  ;;  %93 = vset.pattern.permute.xlu0 %v130_v2 }
   0x2   :  { %7 = vsyncpa [#allocation3], 0  ;;  %34 = vperm.xlu1 %94, %v13_v0   ;;  %17 = vperm.xlu0 %93, %v13_v0   ;;  %v14_v3 = vld [vmem:[%s171_s1 + $0x8] sm:$0xff]  ;;  %v131_v4 = vmov 2   ;;  %v132_v5 = vmov 3   ;;  %vm55_vm0 = vcmask 64512  }
   0x3   :  { %v87_v6 = vld [vmem:[%s170_s0] ss:$0 sm:$0xff]  ;;  %s133_s0 = smov [#allocation2]   ;;  %vm71_vm1 = vcmask 57344  }
   0x4   :  { %s79_s1 = sshll.u32 %s133_s0, 4  ;;  %s80_s1 = int_to_ptr.vmem [resolvable:$true] %s79_s1 }
   0x5   :  { %s105_s15 = scalar_lea.vmem %s80_s1, 16  ;;  %s109_s16 = scalar_lea.vmem %s80_s1, 32 }
   0x6   :  { %38 = vperm.xlu1 %94, %v14_v3   ;;  %22 = vperm.xlu0 %93, %v14_v3   ;;  %p106_p0 = scmp.ne.s32.totalorder %s80_s1, %s105_s15  ;;  %p110_p1 = scmp.lt.s32.totalorder %s80_s1, %s80_s1 }
   0x7   :  { %p111_p2 = scmp.lt.s32.totalorder %s109_s16, %s105_s15 }
   0x9   :  { %p112_p3 = por %p111_p2, %p110_p1 }
   0xa   :  { %95 = vset.pattern.permute.xlu0 %v131_v4  ;;  %96 = vset.pattern.permute.xlu1 %v131_v4 }
   0xb   :  { %46 = vperm.xlu0 %95, %v13_v0   ;;  %50 = vperm.xlu1 %96, %v14_v3   ;;  %p113_p4 = pnand %p112_p3, %p106_p0 }
   0xf   :  { %97 = vset.pattern.permute.xlu1 %v132_v5  ;;  %98 = vset.pattern.permute.xlu0 %v132_v5 }
  0x10   :  { %66 = vperm.xlu1 %97, %v13_v0  }
  0x81   :  { %v35_v7 = vpop.permute.xlu1 %34  ;;  %v18_v8 = vpop.permute.xlu0 %17 }
  0x82   :  { %v31_v9 = vmul.f32 %v87_v6, %v18_v8 }
  0x84   :  { %v41_v10 = vadd.f32 %v35_v7, %v31_v9 }
  0x85   :  { %v23_v11 = vpop.permute.xlu0 %22  ;;  %v39_v13 = vpop.permute.xlu1 %38 }
  0x86   :  { %99 = vtanh.f32 %v41_v10  ;;  %v32_v12 = vmul.f32 %v87_v6, %v23_v11 }
  0x88   :  { %v42_v14 = vadd.f32 %v39_v13, %v32_v12 }
  0x8a   :  { %101 = vtanh.f32 %v42_v14  ;;  %v47_v16 = vpop.permute.xlu0 %46  ;;  %v51_v17 = vpop.permute.xlu1 %50 }
  0x8f   :  { %v67_v29 = vpop.permute.xlu1 %66 }
  0x90   :  { %v100_v15 = vpop.eup %99 }
  0x91   :  { %v53_v18 = vmul.f32 %v100_v15, %v47_v16 }
  0x93   :  { %v56_v21 = vsel %vm55_vm0, %v53_v18, 0.0 }
  0x94   :  { %v102_v19 = vpop.eup %101 }
  0x95   :  { %v54_v20 = vmul.f32 %v102_v19, %v51_v17 }
  0x97   :  { %v57_v22 = vsel %vm55_vm0, %v54_v20, 0.0 }
  0x98   :  { %v58_v23 = vadd.f32 %v57_v22, %v56_v21 }
  0x9a   :  { %v59_v24 = vrot.slane %v58_v23, 4 }
  0x9c   :  { %v60_v25 = vadd.f32 %v59_v24, %v58_v23 }
  0x9e   :  { %v61_v26 = vrot.slane %v60_v25, 2 }
  0xa0   :  { %v62_v27 = vadd.f32 %v61_v26, %v60_v25 }
  0xa2   :  { %v63_v28 = vrot.slane %v62_v27, 1 }
  0xa4   :  { %v64_v30 = vadd.f32 %v63_v28, %v62_v27 }
  0xa6   :  { %v69_v31 = vadd.f32 %v67_v29, %v64_v30 }
  0xa8   :  { %103 = vtanh.f32 %v69_v31 }
  0xb2   :  { %v104_v32 = vpop.eup %103 }
  0xb3   :  { %72 = vst.msk [vmem:[#allocation2] sm:$0x1] %vm71_vm1, %v104_v32 }
  0xb4   :  { %116 = shalt.err (!%p113_p4)
}
  0xb5   :  { %s117_s19 = scalar_lea.hbm %s172_s2, 16 }
  0xb6   :  { %p118_p5 = scmp.ne.s32.totalorder %s172_s2, %s117_s19  ;;  %p121_p6 = scmp.lt.u32.totalorder %s117_s19, %s172_s2 }
  0xb8   :  { %p123_p7 = pnand %p121_p6, %p118_p5 }
  0xba   :  { %126 = shalt.err (!%p123_p7)
}
  0xbb   :  { %82 = dma.vmem_to_hbm [thread:$0]  %s80_s1, 16, %s172_s2, [#allocation3]  }
  0xbc   :  { %127 = dma.done.wait [#allocation3], 16  }
  0xbd   :  { %128 = vsyncadd [#allocation3], 4294967280 }
  0xbe   :  { %86 = vsyncpa [#allocation3], 1 }

</bundles_post_ra>
